<compile_context>
chip_gen: v7x
topology: tpu7x:2x2x1
jax: 0.10.0
libtpu: 0.0.40
codegen_flags: <defaults>
</compile_context>

<pallas_src>
import functools

import jax
import jax.numpy as jnp
from jax import lax
from jax.experimental import pallas as pl
from jax.experimental.pallas import tpu as pltpu

HIDDEN = 128


def _round_up(n, m):
    return ((n + m - 1) // m) * m


def ppo_fused_kernel(x_ref, w1_ref, b1_ref, wh_ref, bh_ref,
                     policy_ref, value_ref, *, num_outputs):
    # fc + relu (f32 accumulate on the MXU, f32 epilogue)
    x = x_ref[...]                                                     # [TB, D_in]
    h = jnp.dot(x, w1_ref[...], preferred_element_type=jnp.float32) + b1_ref[...]
    h = jnp.maximum(h, 0.0)                                            # [TB, 128] f32

    # Fused actor+critic head: one MXU pass, compact [TB, A+1]
    # (lanes 0..A-1 = policy logits, lane A = value).
    z = jnp.dot(h.astype(wh_ref.dtype), wh_ref[...],
                preferred_element_type=jnp.float32) + bh_ref[...]      # [TB, A+1]

    col = lax.broadcasted_iota(jnp.int32, z.shape, 1)
    is_policy = col < num_outputs

    # Numerically stable softmax over the policy lanes only (value lane masked
    # to -inf -> exp() == 0, so the denominator is exact).  Exact divide: the
    # VALU/EUP have huge slack in this memory/overhead-bound kernel.
    logits = jnp.where(is_policy, z, -jnp.inf)
    m = jnp.max(logits, axis=-1, keepdims=True)
    e = jnp.exp(logits - m)
    denom = jnp.sum(e, axis=-1, keepdims=True)
    p = e / denom                                                      # [TB, A+1]

    # Compact stores: masked vst for <128-lane rows is cheap and hidden under DMA.
    policy_ref[...] = p[:, :num_outputs]
    value_ref[...] = z[:, num_outputs:num_outputs + 1]


def fuse_head_params(w_actor, b_actor, w_critic, b_critic):
    """One-time fusion of the actor and critic heads (call at init, not per step)."""
    w_heads = jnp.concatenate([w_actor, w_critic], axis=1)   # [128, A+1]
    b_heads = jnp.concatenate([b_actor, b_critic], axis=1)   # [1, A+1]
    return w_heads, b_heads


def _choose_tile(B, D_in, head_w, block_b):
    # Cap the tile so (double-buffered x/policy/value tiles + resident weights
    # + f32 intermediates h/z/e) fit comfortably in the smallest default scoped
    # VMEM (v5e: 16 MiB).  Rough per-row budget in bytes:
    bytes_per_row = 4 * (2 * D_in + 3 * HIDDEN + 4 * head_w) + 64
    tb_cap = max(8, ((12 << 20) // bytes_per_row) // 8 * 8)
    tb_max = min(block_b, tb_cap)

    n_steps = max(1, pl.cdiv(B, tb_max))
    # Ensure >= 2 grid steps when the batch allows it so v7x's second
    # TensorCore gets work via dimension_semantics=("parallel",).
    # Harmless (sub-microsecond extra step overhead) on 1-TC chips.
    if n_steps < 2 and B >= 16:
        n_steps = 2
    TB = min(_round_up(pl.cdiv(B, n_steps), 8), tb_max)
    n_steps = pl.cdiv(B, TB)
    return TB, n_steps * TB


def ppo_forward(x, w_fc, b_fc, w_heads, b_heads, *, block_b=4096,
                matmul_dtype=jnp.float32):
    """Returns (policy [B, A], value [B, 1]).

    `w_heads`/`b_heads` are the pre-fused actor+critic head (see
    fuse_head_params); A = w_heads.shape[1] - 1.
    `matmul_dtype=jnp.bfloat16` casts the matmul operands to bf16 (v5e win:
    bf16-native MXU, half the x HBM read bytes); accumulation stays f32.
    """
    B, D_in = x.shape
    head_w = w_heads.shape[1]          # A + 1
    A = head_w - 1

    if matmul_dtype != jnp.float32:
        x = x.astype(matmul_dtype)
        w_fc = w_fc.astype(matmul_dtype)
        w_heads = w_heads.astype(matmul_dtype)

    TB, B_pad = _choose_tile(B, D_in, head_w, block_b)
    x_pad = x if B_pad == B else jnp.pad(x, ((0, B_pad - B), (0, 0)))

    policy, value = pl.pallas_call(
        functools.partial(ppo_fused_kernel, num_outputs=A),
        out_shape=(
            jax.ShapeDtypeStruct((B_pad, A), jnp.float32),
            jax.ShapeDtypeStruct((B_pad, 1), jnp.float32),
        ),
        grid=(B_pad // TB,),
        in_specs=[
            pl.BlockSpec((TB, D_in), lambda i: (i, 0)),          # x: tiled on batch
            pl.BlockSpec((D_in, HIDDEN), lambda i: (0, 0)),      # W_fc: VMEM-resident
            pl.BlockSpec((1, HIDDEN), lambda i: (0, 0)),         # b_fc: resident
            pl.BlockSpec((HIDDEN, head_w), lambda i: (0, 0)),    # W_heads: resident
            pl.BlockSpec((1, head_w), lambda i: (0, 0)),         # b_heads: resident
        ],
        out_specs=(
            pl.BlockSpec((TB, A), lambda i: (i, 0)),             # policy (compact)
            pl.BlockSpec((TB, 1), lambda i: (i, 0)),             # value (compact)
        ),
        compiler_params=pltpu.CompilerParams(
            dimension_semantics=("parallel",)),
    )(x_pad, w_fc, b_fc, w_heads, b_heads)

    if B_pad != B:
        policy = policy[:B]
        value = value[:B]
    return policy, value


def xavier_uniform(key, fan_in, fan_out):
    # matches torch.nn.init.xavier_uniform_ (gain=1)
    limit = jnp.sqrt(6.0 / (fan_in + fan_out))
    return jax.random.uniform(key, (fan_in, fan_out), jnp.float32, -limit, limit)


def init_params(key, num_inputs, num_outputs):
    k1, k2, k3 = jax.random.split(key, 3)
    w_fc = xavier_uniform(k1, num_inputs, HIDDEN)
    b_fc = jnp.zeros((1, HIDDEN), jnp.float32)
    w_actor = xavier_uniform(k2, HIDDEN, num_outputs)
    b_actor = jnp.zeros((1, num_outputs), jnp.float32)
    w_critic = xavier_uniform(k3, HIDDEN, 1)
    b_critic = jnp.zeros((1, 1), jnp.float32)
    return w_fc, b_fc, w_actor, b_actor, w_critic, b_critic


if __name__ == "__main__":
    key = jax.random.PRNGKey(0)
    k_x, k_p = jax.random.split(key)

    batch = 8
    num_inputs = 32
    num_outputs = 8

    x = jax.random.normal(k_x, (batch, num_inputs), jnp.float32)
    w_fc, b_fc, w_a, b_a, w_c, b_c = init_params(k_p, num_inputs, num_outputs)

    # One-time head fusion (hoisted out of the forward pass).
    w_heads, b_heads = fuse_head_params(w_a, b_a, w_c, b_c)
    w_heads, b_heads = jax.block_until_ready((w_heads, b_heads))

    policy, value = ppo_forward(x, w_fc, b_fc, w_heads, b_heads)
    jax.block_until_ready((policy, value))

    # Reference check in plain JAX.
    h_ref = jnp.maximum(x @ w_fc + b_fc, 0.0)
    pol_ref = jax.nn.softmax(h_ref @ w_a + b_a, axis=-1)
    val_ref = h_ref @ w_c + b_c

    assert policy.shape == (batch, num_outputs)
    assert value.shape == (batch, 1)
    assert jnp.allclose(policy, pol_ref, atol=1e-4, rtol=1e-4)
    assert jnp.allclose(value, val_ref, atol=1e-4, rtol=1e-4)
    assert jnp.allclose(jnp.sum(policy, axis=-1), 1.0, atol=1e-4)

    # TODO(synk): get_gae / train_model / get_action are host-side RL-loop code,
    # not part of the module's forward pass, and are not kernelized here.

    print("KERNEL_OK")
</pallas_src>

<mosaic_0001>
module attributes {stable_mosaic.version = 11 : i64} {
  func.func @ppo_fused_kernel(%arg0: i32, %arg1: memref<8x32xf32, #tpu.memory_space<vmem>>, %arg2: memref<32x128xf32, #tpu.memory_space<vmem>>, %arg3: memref<1x128xf32, #tpu.memory_space<vmem>>, %arg4: memref<128x9xf32, #tpu.memory_space<vmem>>, %arg5: memref<1x9xf32, #tpu.memory_space<vmem>>, %arg6: memref<8x8xf32, #tpu.memory_space<vmem>>, %arg7: memref<8x1xf32, #tpu.memory_space<vmem>>) attributes {dimension_semantics = [#tpu.dimension_semantics<parallel>], iteration_bounds = array<i64: 1>, scalar_prefetch = 0 : i64, scratch_operands = 0 : i64, tpu.core_type = #tpu.core_type<tc>, window_params = [{transform_indices = @transform_0, window_bounds = array<i64: 8, 32>}, {pipeline_mode = #tpu.pipeline_mode<synchronous>, transform_indices = @transform_1, window_bounds = array<i64: 32, 128>}, {pipeline_mode = #tpu.pipeline_mode<synchronous>, transform_indices = @transform_2, window_bounds = array<i64: 1, 128>}, {pipeline_mode = #tpu.pipeline_mode<synchronous>, transform_indices = @transform_3, window_bounds = array<i64: 128, 9>}, {pipeline_mode = #tpu.pipeline_mode<synchronous>, transform_indices = @transform_4, window_bounds = array<i64: 1, 9>}, {transform_indices = @transform_5, window_bounds = array<i64: 8, 8>}, {transform_indices = @transform_6, window_bounds = array<i64: 8, 1>}]} {
    %c0 = arith.constant 0 : index
    %c0_0 = arith.constant 0 : index
    %0 = vector.load %arg1[%c0, %c0_0] : memref<8x32xf32, #tpu.memory_space<vmem>>, vector<8x32xf32>
    %c0_1 = arith.constant 0 : index
    %c0_2 = arith.constant 0 : index
    %1 = vector.load %arg2[%c0_1, %c0_2] : memref<32x128xf32, #tpu.memory_space<vmem>>, vector<32x128xf32>
    %cst = arith.constant dense<0.000000e+00> : vector<8x128xf32>
    %2 = tpu.matmul %0, %1, %cst {dimension_numbers = #tpu.dot_dimension_numbers<[1], [0], [0], [1], [0, 0, 1, 1], [], []>} : vector<8x32xf32>, vector<32x128xf32>, vector<8x128xf32> -> vector<8x128xf32>
    %c0_3 = arith.constant 0 : index
    %c0_4 = arith.constant 0 : index
    %3 = vector.load %arg3[%c0_3, %c0_4] : memref<1x128xf32, #tpu.memory_space<vmem>>, vector<1x128xf32>
    %4 = vector.broadcast %3 : vector<1x128xf32> to vector<8x128xf32>
    %5 = arith.addf %2, %4 : vector<8x128xf32>
    %cst_5 = arith.constant 0.000000e+00 : f32
    %6 = vector.broadcast %cst_5 : f32 to vector<8x128xf32>
    %7 = arith.maximumf %5, %6 : vector<8x128xf32>
    %c0_6 = arith.constant 0 : index
    %c0_7 = arith.constant 0 : index
    %8 = vector.load %arg4[%c0_6, %c0_7] : memref<128x9xf32, #tpu.memory_space<vmem>>, vector<128x9xf32>
    %cst_8 = arith.constant dense<0.000000e+00> : vector<8x9xf32>
    %9 = tpu.matmul %7, %8, %cst_8 {dimension_numbers = #tpu.dot_dimension_numbers<[1], [0], [0], [1], [0, 0, 1, 1], [], []>} : vector<8x128xf32>, vector<128x9xf32>, vector<8x9xf32> -> vector<8x9xf32>
    %c0_9 = arith.constant 0 : index
    %c0_10 = arith.constant 0 : index
    %10 = vector.load %arg5[%c0_9, %c0_10] : memref<1x9xf32, #tpu.memory_space<vmem>>, vector<1x9xf32>
    %11 = vector.broadcast %10 : vector<1x9xf32> to vector<8x9xf32>
    %12 = arith.addf %9, %11 : vector<8x9xf32>
    %13 = tpu.iota {dimensions = array<i32: 1>} : vector<8x9xi32>
    %c8_i32 = arith.constant 8 : i32
    %14 = vector.broadcast %c8_i32 : i32 to vector<8x9xi32>
    %15 = arith.cmpi slt, %13, %14 : vector<8x9xi32>
    %cst_11 = arith.constant 0xFF800000 : f32
    %16 = vector.broadcast %cst_11 : f32 to vector<8x9xf32>
    %17 = arith.select %15, %12, %16 : vector<8x9xi1>, vector<8x9xf32>
    %cst_12 = arith.constant dense<0xFF800000> : vector<8xf32>
    %18 = vector.multi_reduction <maximumf>, %17, %cst_12 [1] : vector<8x9xf32> to vector<8xf32>
    %19 = vector.shape_cast %18 : vector<8xf32> to vector<8x1xf32>
    %20 = vector.broadcast %19 : vector<8x1xf32> to vector<8x9xf32>
    %21 = arith.subf %17, %20 : vector<8x9xf32>
    %22 = math.exp %21 : vector<8x9xf32>
    %cst_13 = arith.constant dense<0.000000e+00> : vector<8xf32>
    %23 = vector.multi_reduction <add>, %22, %cst_13 [1] : vector<8x9xf32> to vector<8xf32>
    %24 = vector.shape_cast %23 : vector<8xf32> to vector<8x1xf32>
    %25 = vector.broadcast %24 : vector<8x1xf32> to vector<8x9xf32>
    %26 = arith.divf %22, %25 : vector<8x9xf32>
    %27 = vector.extract_strided_slice %26 {offsets = [0, 0], sizes = [8, 8], strides = [1, 1]} : vector<8x9xf32> to vector<8x8xf32>
    %c0_14 = arith.constant 0 : index
    %c0_15 = arith.constant 0 : index
    %28 = vector.load %arg6[%c0_14, %c0_15] : memref<8x8xf32, #tpu.memory_space<vmem>>, vector<8x8xf32>
    tpu.vector_store %arg6[%c0_14, %c0_15], %27 {strides = array<i32>} : memref<8x8xf32, #tpu.memory_space<vmem>>, vector<8x8xf32>,
    %29 = vector.extract_strided_slice %12 {offsets = [0, 8], sizes = [8, 1], strides = [1, 1]} : vector<8x9xf32> to vector<8x1xf32>
    %c0_16 = arith.constant 0 : index
    %c0_17 = arith.constant 0 : index
    %30 = vector.load %arg7[%c0_16, %c0_17] : memref<8x1xf32, #tpu.memory_space<vmem>>, vector<8x1xf32>
    tpu.vector_store %arg7[%c0_16, %c0_17], %29 {strides = array<i32>} : memref<8x1xf32, #tpu.memory_space<vmem>>, vector<8x1xf32>,
    return
  }
  func.func @transform_0(%arg0: i32) -> (i32, i32) {
    %c0_i32 = arith.constant 0 : i32
    %c0_i32_0 = arith.constant 0 : i32
    return %arg0, %c0_i32 : i32, i32
  }
  func.func @transform_1(%arg0: i32) -> (i32, i32) {
    %c0_i32 = arith.constant 0 : i32
    %c0_i32_0 = arith.constant 0 : i32
    %c0_i32_1 = arith.constant 0 : i32
    return %c0_i32, %c0_i32_0 : i32, i32
  }
  func.func @transform_2(%arg0: i32) -> (i32, i32) {
    %c0_i32 = arith.constant 0 : i32
    %c0_i32_0 = arith.constant 0 : i32
    %c0_i32_1 = arith.constant 0 : i32
    return %c0_i32, %c0_i32_0 : i32, i32
  }
  func.func @transform_3(%arg0: i32) -> (i32, i32) {
    %c0_i32 = arith.constant 0 : i32
    %c0_i32_0 = arith.constant 0 : i32
    %c0_i32_1 = arith.constant 0 : i32
    return %c0_i32, %c0_i32_0 : i32, i32
  }
  func.func @transform_4(%arg0: i32) -> (i32, i32) {
    %c0_i32 = arith.constant 0 : i32
    %c0_i32_0 = arith.constant 0 : i32
    %c0_i32_1 = arith.constant 0 : i32
    return %c0_i32, %c0_i32_0 : i32, i32
  }
  func.func @transform_5(%arg0: i32) -> (i32, i32) {
    %c0_i32 = arith.constant 0 : i32
    %c0_i32_0 = arith.constant 0 : i32
    return %arg0, %c0_i32 : i32, i32
  }
  func.func @transform_6(%arg0: i32) -> (i32, i32) {
    %c0_i32 = arith.constant 0 : i32
    %c0_i32_0 = arith.constant 0 : i32
    return %arg0, %c0_i32 : i32, i32
  }
}

</mosaic_0001>

<bundles_post_ra>
// kernel: tpu_custom_call.1
= control target key start
LH: loop header
LB: loop body
LE: loop exit
PB: predicated region body
PF: predicated region fallthrough
CT: control target
= control target key end

     0   :  { %v379_v3 = vmov 0.0|0.0   ;;  %vm380_vm0 = vmmov 0   ;;  %v381_v6 = vmov 0.0   ;;  %s503_s0 = inlined_call_operand.vmem [shape: f32[8,32], index: 0, kind: input, shape index: {}]   ;;  %s504_s1 = inlined_call_operand.vmem [shape: f32[32,128], index: 1, kind: input, shape index: {}]   ;;  %s505_s2 = inlined_call_operand.vmem [shape: f32[1,128], index: 2, kind: input, shape index: {}]   ;;  %s506_s3 = inlined_call_operand.vmem [shape: f32[128,9], index: 3, kind: input, shape index: {}]   ;;  %s507_s4 = inlined_call_operand.vmem [shape: f32[1,9], index: 4, kind: input, shape index: {}]   ;;  %s508_s5 = inlined_call_operand.hbm [shape: f32[8,8], index: 5, kind: output, shape index: {0}]   ;;  %s509_s6 = inlined_call_operand.vmem [shape: f32[8,1], index: 6, kind: output, shape index: {1}]  }
   0x1   :  { %v24_v0 = vld [vmem:[%s504_s1] sm:$0xff]  ;;  %v25_v1 = vld [vmem:[%s504_s1 + $0x8] sm:$0xff]  ;;  %v26_v2 = vld [vmem:[%s504_s1 + $0x10] sm:$0xff]  ;;  %316 = vmatprep.subr.bf16.mxu0 %v379_v3  ;;  %278 = vmatprep.mubr.msk.f32.mxu0 %vm380_vm0, %v381_v6 }
   0x2   :  { %v317_v4 = vpack.c.bf16 %v25_v1, %v24_v0  ;;  %v27_v5 = vld [vmem:[%s504_s1 + $0x18] sm:$0xff]  ;;  %v110_v7 = vld [vmem:[%s506_s3] sm:$0xff]  ;;  %322 = vmatprep.subr.bf16.mxu1 %v379_v3  ;;  %v111_v8 = vld [vmem:[%s506_s3 + $0x8] sm:$0xff]  ;;  %313 = vmatprep.mubr.msk.f32.mxu1 %vm380_vm0, %v381_v6 }
   0x3   :  { %v112_v9 = vld [vmem:[%s506_s3 + $0x10] sm:$0xff]  ;;  %v113_v10 = vld [vmem:[%s506_s3 + $0x18] sm:$0xff]  ;;  %v320_v11 = vpack.c.bf16 %v27_v5, %v26_v2  ;;  %v323_v12 = vpack.c.bf16 %v111_v8, %v110_v7  ;;  %v114_v14 = vld [vmem:[%s506_s3 + $0x20] sm:$0xff] }
   0x4   :  { %318 = vmatpush3.bf16.msra.mxu0 %v317_v4  ;;  %v326_v13 = vpack.c.bf16 %v113_v10, %v112_v9  ;;  %v115_v15 = vld [vmem:[%s506_s3 + $0x28] sm:$0xff] }
   0x5   :  { %319 = vmatprep.subr.bf16.mxu0 %v379_v3  ;;  %324 = vmatpush3.bf16.msra.mxu1 %v323_v12 }
   0x6   :  { %325 = vmatprep.subr.bf16.mxu1 %v379_v3 }
   0x7   :  { %12 = vsyncpa [#allocation3], 0  ;;  %v23_v16 = vld [vmem:[%s503_s0] sm:$0xff]  ;;  %vm35_vm1 = vcmask 261120   ;;  %v329_v17 = vpack.c.bf16 %v115_v15, %v114_v14  ;;  %v116_v18 = vld [vmem:[%s506_s3 + $0x30] sm:$0xff]  ;;  %v203_v38 = vlaneseq  ;;  %vm207_vm3 = vcmask 72704  }
   0x8   :  { %321 = vmatpush3.bf16.msra.mxu0 %v320_v11  ;;  %v117_v19 = vld [vmem:[%s506_s3 + $0x38] sm:$0xff]  ;;  %v118_v21 = vld [vmem:[%s506_s3 + $0x40] sm:$0xff]  ;;  %v119_v22 = vld [vmem:[%s506_s3 + $0x48] sm:$0xff]  ;;  %vm225_vm4 = vcmask 7168   ;;  %vm219_vm5 = vcmask 64512  }
   0x9   :  { %327 = vmatpush3.bf16.msra.mxu1 %v326_v13  ;;  %v332_v20 = vpack.c.bf16 %v117_v19, %v116_v18  ;;  %v335_v23 = vpack.c.bf16 %v119_v22, %v118_v21  ;;  %v120_v24 = vld [vmem:[%s506_s3 + $0x50] sm:$0xff]  ;;  %v121_v25 = vld [vmem:[%s506_s3 + $0x58] sm:$0xff]  ;;  %v122_v27 = vld [vmem:[%s506_s3 + $0x60] sm:$0xff]  ;;  %v204_v39 = vand.u32 127, %v203_v38 }
   0xa   :  { %328 = vmatprep.subr.bf16.mxu1 %v379_v3  ;;  %v338_v26 = vpack.c.bf16 %v121_v25, %v120_v24  ;;  %v123_v28 = vld [vmem:[%s506_s3 + $0x68] sm:$0xff]  ;;  %v124_v30 = vld [vmem:[%s506_s3 + $0x70] sm:$0xff]  ;;  %v125_v31 = vld [vmem:[%s506_s3 + $0x78] sm:$0xff]  ;;  %s382_s3 = smov 120  }
   0xb   :  { %279 = vmatmul.mubr.msk.f32.vlgmr.msra.gmra.mrb[0].mxu0 %vm35_vm1, %v23_v16  ;;  %v341_v29 = vpack.c.bf16 %v123_v28, %v122_v27  ;;  %v344_v32 = vpack.c.bf16 %v125_v31, %v124_v30  ;;  %v245_v33 = vld [vmem:[%s505_s2] ss:$0 sm:$0xff]  ;;  %vm205_vm2 = vcmp.lt.s32.totalorder %v204_v39, 8 }
   0xc   :  { %v247_v40 = vld [vmem:[%s507_s4] ss:$0 sm:$0xff]  ;;  %s383_s4 = smov [#allocation2]  }
   0xd   :  { %330 = vmatpush3.bf16.msra.mxu1 %v329_v17  ;;  %s233_s17 = sshll.u32 %s383_s4, 4  ;;  %s234_s17 = int_to_ptr.vmem [resolvable:$true] %s233_s17 }
   0xe   :  { %331 = vmatprep.subr.bf16.mxu1 %v379_v3  ;;  %s355_s18 = scalar_lea.vmem %s234_s17, 128  ;;  %p360_p1 = scmp.lt.s32.totalorder %s234_s17, %s234_s17 }
   0xf   :  { %p356_p0 = scmp.ne.s32.totalorder %s234_s17, %s355_s18  ;;  %p361_p2 = scmp.lt.s32.totalorder %s355_s18, %s355_s18 }
  0x11   :  { %333 = vmatpush3.bf16.msra.mxu1 %v332_v20  ;;  %p362_p3 = por %p361_p2, %p360_p1 }
  0x12   :  { %334 = vmatprep.subr.bf16.mxu1 %v379_v3 }
  0x13   :  { %p363_p4 = pnand %p362_p3, %p356_p0 }
  0x15   :  { %336 = vmatpush3.bf16.msra.mxu1 %v335_v23 }
  0x16   :  { %337 = vmatprep.subr.bf16.mxu1 %v379_v3 }
  0x19   :  { %339 = vmatpush3.bf16.msra.mxu1 %v338_v26 }
  0x1a   :  { %340 = vmatprep.subr.bf16.mxu1 %v379_v3 }
  0x1d   :  { %342 = vmatpush3.bf16.msra.mxu1 %v341_v29 }
  0x1e   :  { %343 = vmatprep.subr.bf16.mxu1 %v379_v3 }
  0x21   :  { %345 = vmatpush3.bf16.msra.mxu1 %v344_v32 }
  0xde   :  { %v105_v34 = vpop.f32.mrb[0].mxu0 }
  0xdf   :  { %v106_v35 = vadd.f32 %v245_v33, %v105_v34  ;;  %v280_v36 = vpop.f32.mrb[1].mxu0 }
  0xe1   :  { %v109_v37 = vmax.f32 %v106_v35, 0.0 }
  0xe3   :  { %314 = vmatmul.mubr.f32.vlgmr.msra.gmra.mrb[0].mxu1 %v109_v37 }
 0x1b6   :  { %v199_v41 = vpop.f32.mrb[0].mxu1 }
 0x1b7   :  { %v200_v42 = vadd.f32 %v247_v40, %v199_v41  ;;  %v315_v43 = vpop.f32.mrb[1].mxu1 }
 0x1b9   :  { %222 = vrot.lane.b32.xlu1 %v200_v42, %s382_s3  ;;  %v206_v44 = vsel %vm205_vm2, %v200_v42, -inf }
 0x1ba   :  { %v208_v45 = vsel %vm207_vm3, %v206_v44, -inf }
 0x1bb   :  { %209 = vmax.xlane.f32.xlu0 %v208_v45 }
 0x22b   :  { %v223_v46 = vpop.permute.xlu1 %222 }
 0x22c   :  { %226 = vst.msk [vmem:[%s509_s6] sm:$0xff] %vm225_vm4, %v223_v46 }
 0x248   :  { %v210_v47 = vpop.xlane.xlu0 %209 }
 0x249   :  { %v211_v48 = vsub.f32 %v206_v44, %v210_v47 }
 0x24b   :  { %v212_v49 = vmul.f32 1.442695, %v211_v48 }
 0x24d   :  { %351 = vpow2.f32 %v212_v49 }
 0x257   :  { %v352_v50 = vpop.eup %351 }
 0x258   :  { %v214_v51 = vsel %vm207_vm3, %v352_v50, 0.0 }
 0x259   :  { %215 = vadd.xlane.f32.xlu0 %v214_v51 }
 0x2e6   :  { %v216_v52 = vpop.xlane.xlu0 %215 }
 0x2e7   :  { %353 = vrcp.f32 %v216_v52 }
 0x2f1   :  { %v354_v53 = vpop.eup %353 }
 0x2f2   :  { %v218_v54 = vmul.f32 %v354_v53, %v352_v50 }
 0x2f4   :  { %220 = vst.msk [vmem:[#allocation2] sm:$0xff] %vm219_vm5, %v218_v54 }
 0x2f5   :  { %366 = shalt.err (!%p363_p4)
}
 0x2f6   :  { %s367_s20 = scalar_lea.hbm %s508_s5, 128 }
 0x2f7   :  { %p368_p5 = scmp.ne.s32.totalorder %s508_s5, %s367_s20  ;;  %p371_p6 = scmp.lt.u32.totalorder %s367_s20, %s508_s5 }
 0x2f9   :  { %p373_p7 = pnand %p371_p6, %p368_p5 }
 0x2fb   :  { %376 = shalt.err (!%p373_p7)
}
 0x2fc   :  { %236 = dma.vmem_to_hbm [thread:$0]  %s234_s17, 128, %s508_s5, [#allocation3]  }
 0x2fd   :  { %377 = dma.done.wait [#allocation3], 128  }
 0x2fe   :  { %378 = vsyncadd [#allocation3], 4294967168 }
 0x2ff   :  { %244 = vsyncpa [#allocation3], 1 }

</bundles_post_ra>
